<compile_context>
chip_gen: v7x
topology: tpu7x:2x2x1
jax: 0.10.0
libtpu: 0.0.40
codegen_flags: <defaults>
</compile_context>

<pallas_src>
import functools

import numpy as np

import jax
import jax.numpy as jnp
from jax.experimental import pallas as pl
from jax.experimental.pallas import tpu as pltpu

ALPHA = 10.0          # depth_si_loss alpha
LAMBDA_SCALE = 0.85   # depth_si_loss lambda_scale
EPS = 1e-5            # depth_si_loss eps
SIG_W = 10.0          # DepthSigLoss(weight_sig=10.0)
# max_depth=10 is stored on the module but unused in forward.


def _device_tuning():
    """Per-generation (per-input block bytes, vmem_limit_bytes)."""
    kind = ""
    try:
        kind = (jax.devices()[0].device_kind or "").lower()
    except Exception:
        pass
    if "v7" in kind:
        # ~3.2 TB/s HBM per TC: big blocks to amortize the ~0.35us/step overhead.
        return 8 << 20, 48 << 20
    if "v6" in kind:
        return 4 << 20, 40 << 20
    if "v5" in kind and ("lite" in kind or "5e" in kind):
        # v5e: keep 2 inputs x 2 buffers comfortably under scoped VMEM.
        return 3 << 20, 28 << 20
    return 2 << 20, 32 << 20   # conservative default


def _sublane_multiple(*dtypes):
    m = 8
    for dt in dtypes:
        m = max(m, 32 // max(1, jnp.dtype(dt).itemsize))
    return m


def _choose_row_tile(n_rows, row_bytes, sub_mult, target_bytes):
    """Pick a row tile TH (sublane-aligned).  Prefer exact divisors of n_rows so there is
    no ragged tail (-> no per-tile bounds mask); otherwise return TH + ragged flag."""
    target_rows = max(1, target_bytes // max(1, row_bytes))
    if target_rows >= n_rows:
        return n_rows, False               # whole image in one block
    max_rows = max(sub_mult, (target_rows // sub_mult) * sub_mult)
    d = min(max_rows, n_rows)
    d -= d % sub_mult
    best = 0
    while d >= sub_mult:
        if n_rows % d == 0:
            best = d
            break
        d -= sub_mult
    if best >= max(sub_mult, max_rows // 4):
        return best, False
    th = min(max_rows, n_rows)
    return th, (n_rows % th) != 0


def _sum_all(x):
    # (8, LAST) -> (1, 1): lane reduce then sublane reduce (finalize only).
    return jnp.sum(jnp.sum(x, axis=-1, keepdims=True), axis=0, keepdims=True)


def _make_kernel(total_rows, th, last, lambda_scale, eps, ragged):
    fold8 = (th % 8 == 0)

    def kernel(pred_ref, tgt_ref, out_ref, s1_ref, s2_ref, nv_ref):
        s = pl.program_id(1)

        @pl.when(s == 0)
        def _init():
            s1_ref[...] = jnp.zeros_like(s1_ref)
            s2_ref[...] = jnp.zeros_like(s2_ref)
            nv_ref[...] = jnp.zeros_like(nv_ref)

        # Native-dtype stream from HBM; widen in-register.
        p = pred_ref[...].astype(jnp.float32)    # (th, last)
        t = tgt_ref[...].astype(jnp.float32)     # (th, last)

        valid = t > 0.0
        if ragged:
            # Mask rows past the real extent (only the last tile is partial); the (th, 1)
            # iota keeps the compare cheap and broadcasts into the existing where.
            rows = s * th + jax.lax.broadcasted_iota(jnp.int32, (th, 1), 0)
            valid = jnp.logical_and(valid, rows < total_rows)

        lp = jnp.log(jnp.maximum(p, eps))
        lt = jnp.log(jnp.maximum(t, eps))
        diff = jnp.where(valid, lp - lt, 0.0)
        vf = valid.astype(jnp.float32)

        if fold8:
            # Pure-VPU accumulation: fold (th, last) into (8, last) via vreg-group adds;
            # no XLU reduce and no 1-element RMW on the per-tile hot path.
            def fold(x):
                return jnp.sum(x.reshape(th // 8, 8, last), axis=0)

            s1_ref[...] = s1_ref[...] + fold(diff)
            s2_ref[...] = s2_ref[...] + fold(diff * diff)
            nv_ref[...] = nv_ref[...] + fold(vf)
        else:
            # Tiny / non-sublane-aligned tiles only (e.g. whole image < 8 rows).
            s1_ref[0:1, :] = s1_ref[0:1, :] + jnp.sum(diff, axis=0, keepdims=True)
            s2_ref[0:1, :] = s2_ref[0:1, :] + jnp.sum(diff * diff, axis=0, keepdims=True)
            nv_ref[0:1, :] = nv_ref[0:1, :] + jnp.sum(vf, axis=0, keepdims=True)

        @pl.when(s == pl.num_programs(1) - 1)
        def _finalize():
            s1 = _sum_all(s1_ref[...])
            s2 = _sum_all(s2_ref[...])
            nv = jnp.maximum(_sum_all(nv_ref[...]), 1.0)
            diff_mean = s2 / nv
            diff_var = (s1 * s1) / (nv * nv)
            # Clamp at 0: guards against tiny negative arguments from FP rounding
            # (mathematically diff_mean >= lambda * diff_var).
            out_ref[...] = jnp.sqrt(
                jnp.maximum(diff_mean - lambda_scale * diff_var, 0.0))

    return kernel


@functools.partial(
    jax.jit,
    static_argnames=("alpha", "lambda_scale", "eps", "weight_sig", "target_block_bytes"),
)
def depth_sig_loss_pallas(pred, target, *, alpha=ALPHA, lambda_scale=LAMBDA_SCALE,
                          eps=EPS, weight_sig=SIG_W, target_block_bytes=None):
    assert pred.shape == target.shape, f"{pred.shape} != {target.shape}"
    assert pred.ndim >= 2

    # PyTorch reduces over (-1,-2) per "image" and means over everything else; collapsing
    # all leading dims into B is equivalent.
    *lead, H, W = pred.shape
    B = int(np.prod(lead)) if lead else 1
    pred = pred.reshape(B, H, W)
    target = target.reshape(B, H, W)

    tuned_bytes, vmem_limit = _device_tuning()
    if target_block_bytes is None:
        target_block_bytes = tuned_bytes

    itemsize = max(jnp.dtype(pred.dtype).itemsize, jnp.dtype(target.dtype).itemsize)
    sub_mult = _sublane_multiple(pred.dtype, target.dtype)

    N = H * W
    if N % 128 == 0:
        # Lane-dense layout: flatten spatial dims (free, contiguous reshape) so vregs are
        # fully occupied even when W < 128 or W % 128 != 0.
        R, LAST = N // 128, 128
        x_p = pred.reshape(B, R, LAST)
        x_t = target.reshape(B, R, LAST)
    else:
        R, LAST = H, W
        x_p, x_t = pred, target

    TH, ragged = _choose_row_tile(R, LAST * itemsize, sub_mult, target_block_bytes)
    n_spatial = pl.cdiv(R, TH)

    kernel = _make_kernel(R, TH, LAST, lambda_scale, eps, ragged)

    # TODO(synk): for v7x with B < 2 a 2-way split of the spatial axis marked "parallel"
    # would engage both TensorCores; omitted to keep the resident-accumulator structure simple.
    terms = pl.pallas_call(
        kernel,
        out_shape=jax.ShapeDtypeStruct((B, 1, 1), jnp.float32),
        grid_spec=pltpu.PrefetchScalarGridSpec(
            num_scalar_prefetch=0,
            grid=(B, n_spatial),
            in_specs=[
                pl.BlockSpec((None, TH, LAST), lambda b, s: (b, s, 0)),
                pl.BlockSpec((None, TH, LAST), lambda b, s: (b, s, 0)),
            ],
            # One per-image term; resident across the spatial (reduction) axis.
            out_specs=pl.BlockSpec((None, 1, 1), lambda b, s: (b, 0, 0)),
            scratch_shapes=[
                pltpu.VMEM((8, LAST), jnp.float32),   # sum(diff)
                pltpu.VMEM((8, LAST), jnp.float32),   # sum(diff^2)
                pltpu.VMEM((8, LAST), jnp.float32),   # num_valid
            ],
        ),
        compiler_params=pltpu.CompilerParams(
            dimension_semantics=("parallel", "arbitrary"),
            vmem_limit_bytes=vmem_limit,
        ),
    )(x_p, x_t)

    # Batch mean + alpha (depth_si_loss) + sig_w (module weight) in plain JAX (tiny).
    loss = weight_sig * alpha * jnp.mean(terms[:, 0, 0])
    return loss, {"loss_s": loss}


def _reference_loss(pred, target, alpha=ALPHA, lambda_scale=LAMBDA_SCALE,
                    eps=EPS, weight_sig=SIG_W):
    # Pure-JAX reference mirroring the PyTorch code, for a correctness check.
    pred = pred.astype(jnp.float32).reshape(-1, *pred.shape[-2:])
    target = target.astype(jnp.float32).reshape(-1, *target.shape[-2:])
    valid = (target > 0).astype(jnp.float32)
    num_valid = jnp.maximum(valid.sum(axis=(-1, -2)), 1.0)
    lp = jnp.log(jnp.maximum(pred, eps))
    lt = jnp.log(jnp.maximum(target, eps))
    diff = (lp - lt) * valid
    diff_mean = (diff ** 2).sum(axis=(-2, -1)) / num_valid
    diff_var = diff.sum(axis=(-2, -1)) ** 2 / num_valid ** 2
    loss = alpha * jnp.sqrt(diff_mean - lambda_scale * diff_var).mean()
    return weight_sig * loss


if __name__ == "__main__":
    key = jax.random.PRNGKey(0)

    def _check(idx, shape, target_block_bytes=None):
        k1, k2 = jax.random.split(jax.random.fold_in(key, idx))
        # pred: positive depths; target: some non-positive values to exercise the mask.
        pred = jax.random.uniform(k1, shape, jnp.float32, minval=0.01, maxval=10.0)
        target = jax.random.uniform(k2, shape, jnp.float32, minval=-2.0, maxval=10.0)
        loss, aux = depth_sig_loss_pallas(pred, target,
                                          target_block_bytes=target_block_bytes)
        jax.block_until_ready(loss)
        jax.block_until_ready(aux["loss_s"])
        ref = _reference_loss(pred, target)
        assert jnp.allclose(loss, ref, rtol=1e-5, atol=1e-4), (shape, loss, ref)

    _check(0, (2, 16, 16))                                    # lane-dense flattened path
    _check(1, (2, 16, 20))                                    # W not a multiple of 128 -> (TH, W) path
    _check(2, (2, 33, 128), target_block_bytes=8 * 128 * 4)   # forced tiling + ragged tail mask
    print("KERNEL_OK")
</pallas_src>

<mosaic_0001>
module attributes {stable_mosaic.version = 11 : i64} {
  func.func @kernel(%arg0: i32, %arg1: i32, %arg2: memref<1x2x128xf32, #tpu.memory_space<vmem>>, %arg3: memref<1x2x128xf32, #tpu.memory_space<vmem>>, %arg4: memref<1x1x1xf32, #tpu.memory_space<vmem>>, %arg5: memref<8x128xf32, #tpu.memory_space<vmem>>, %arg6: memref<8x128xf32, #tpu.memory_space<vmem>>, %arg7: memref<8x128xf32, #tpu.memory_space<vmem>>) attributes {dimension_semantics = [#tpu.dimension_semantics<parallel>, #tpu.dimension_semantics<arbitrary>], iteration_bounds = array<i64: 2, 1>, scalar_prefetch = 0 : i64, scratch_operands = 3 : i64, tpu.core_type = #tpu.core_type<tc>, window_params = [{transform_indices = @transform_0, window_bounds = array<i64: 1, 2, 128>}, {transform_indices = @transform_1, window_bounds = array<i64: 1, 2, 128>}, {transform_indices = @transform_2, window_bounds = array<i64: 1, 1, 1>}]} {
    %c0_i32 = arith.constant 0 : i32
    %0 = arith.cmpi eq, %arg1, %c0_i32 : i32
    %1 = arith.extui %0 : i1 to i32
    %c0_i32_0 = arith.constant 0 : i32
    %2 = arith.cmpi ne, %1, %c0_i32_0 : i32
    scf.if %2 {
      %cst_26 = arith.constant 0.000000e+00 : f32
      %39 = vector.broadcast %cst_26 : f32 to vector<8x128xf32>
      %c0_27 = arith.constant 0 : index
      %c0_28 = arith.constant 0 : index
      %40 = vector.load %arg5[%c0_27, %c0_28] : memref<8x128xf32, #tpu.memory_space<vmem>>, vector<8x128xf32>
      tpu.vector_store %arg5[%c0_27, %c0_28], %39 {strides = array<i32>} : memref<8x128xf32, #tpu.memory_space<vmem>>, vector<8x128xf32>,
      %cst_29 = arith.constant 0.000000e+00 : f32
      %41 = vector.broadcast %cst_29 : f32 to vector<8x128xf32>
      %c0_30 = arith.constant 0 : index
      %c0_31 = arith.constant 0 : index
      %42 = vector.load %arg6[%c0_30, %c0_31] : memref<8x128xf32, #tpu.memory_space<vmem>>, vector<8x128xf32>
      tpu.vector_store %arg6[%c0_30, %c0_31], %41 {strides = array<i32>} : memref<8x128xf32, #tpu.memory_space<vmem>>, vector<8x128xf32>,
      %cst_32 = arith.constant 0.000000e+00 : f32
      %43 = vector.broadcast %cst_32 : f32 to vector<8x128xf32>
      %c0_33 = arith.constant 0 : index
      %c0_34 = arith.constant 0 : index
      %44 = vector.load %arg7[%c0_33, %c0_34] : memref<8x128xf32, #tpu.memory_space<vmem>>, vector<8x128xf32>
      tpu.vector_store %arg7[%c0_33, %c0_34], %43 {strides = array<i32>} : memref<8x128xf32, #tpu.memory_space<vmem>>, vector<8x128xf32>,
    } else {
    }
    %c0 = arith.constant 0 : index
    %c0_1 = arith.constant 0 : index
    %c0_2 = arith.constant 0 : index
    %3 = vector.load %arg2[%c0, %c0_1, %c0_2] : memref<1x2x128xf32, #tpu.memory_space<vmem>>, vector<1x2x128xf32>
    %4 = vector.shape_cast %3 : vector<1x2x128xf32> to vector<2x128xf32>
    %c0_3 = arith.constant 0 : index
    %c0_4 = arith.constant 0 : index
    %c0_5 = arith.constant 0 : index
    %5 = vector.load %arg3[%c0_3, %c0_4, %c0_5] : memref<1x2x128xf32, #tpu.memory_space<vmem>>, vector<1x2x128xf32>
    %6 = vector.shape_cast %5 : vector<1x2x128xf32> to vector<2x128xf32>
    %cst = arith.constant 0.000000e+00 : f32
    %7 = vector.broadcast %cst : f32 to vector<2x128xf32>
    %8 = arith.cmpf ogt, %6, %7 : vector<2x128xf32>
    %cst_6 = arith.constant 9.99999974E-6 : f32
    %9 = vector.broadcast %cst_6 : f32 to vector<2x128xf32>
    %10 = arith.maximumf %4, %9 : vector<2x128xf32>
    %11 = math.log %10 : vector<2x128xf32>
    %cst_7 = arith.constant 9.99999974E-6 : f32
    %12 = vector.broadcast %cst_7 : f32 to vector<2x128xf32>
    %13 = arith.maximumf %6, %12 : vector<2x128xf32>
    %14 = math.log %13 : vector<2x128xf32>
    %15 = arith.subf %11, %14 : vector<2x128xf32>
    %cst_8 = arith.constant 0.000000e+00 : f32
    %16 = vector.broadcast %cst_8 : f32 to vector<2x128xf32>
    %17 = arith.select %8, %15, %16 : vector<2x128xi1>, vector<2x128xf32>
    %18 = arith.extui %8 : vector<2x128xi1> to vector<2x128xi32>
    %19 = arith.sitofp %18 : vector<2x128xi32> to vector<2x128xf32>
    %c0_9 = arith.constant 0 : index
    %c0_10 = arith.constant 0 : index
    %20 = vector.load %arg5[%c0_9, %c0_10] : memref<8x128xf32, #tpu.memory_space<vmem>>, vector<1x128xf32>
    %cst_11 = arith.constant dense<0.000000e+00> : vector<128xf32>
    %21 = vector.multi_reduction <add>, %17, %cst_11 [0] : vector<2x128xf32> to vector<128xf32>
    %22 = vector.shape_cast %21 : vector<128xf32> to vector<1x128xf32>
    %23 = arith.addf %20, %22 : vector<1x128xf32>
    %c0_12 = arith.constant 0 : index
    %c0_13 = arith.constant 0 : index
    %24 = vector.load %arg5[%c0_12, %c0_13] : memref<8x128xf32, #tpu.memory_space<vmem>>, vector<1x128xf32>
    tpu.vector_store %arg5[%c0_12, %c0_13], %23 {strides = array<i32>} : memref<8x128xf32, #tpu.memory_space<vmem>>, vector<1x128xf32>,
    %c0_14 = arith.constant 0 : index
    %c0_15 = arith.constant 0 : index
    %25 = vector.load %arg6[%c0_14, %c0_15] : memref<8x128xf32, #tpu.memory_space<vmem>>, vector<1x128xf32>
    %26 = arith.mulf %17, %17 : vector<2x128xf32>
    %cst_16 = arith.constant dense<0.000000e+00> : vector<128xf32>
    %27 = vector.multi_reduction <add>, %26, %cst_16 [0] : vector<2x128xf32> to vector<128xf32>
    %28 = vector.shape_cast %27 : vector<128xf32> to vector<1x128xf32>
    %29 = arith.addf %25, %28 : vector<1x128xf32>
    %c0_17 = arith.constant 0 : index
    %c0_18 = arith.constant 0 : index
    %30 = vector.load %arg6[%c0_17, %c0_18] : memref<8x128xf32, #tpu.memory_space<vmem>>, vector<1x128xf32>
    tpu.vector_store %arg6[%c0_17, %c0_18], %29 {strides = array<i32>} : memref<8x128xf32, #tpu.memory_space<vmem>>, vector<1x128xf32>,
    %c0_19 = arith.constant 0 : index
    %c0_20 = arith.constant 0 : index
    %31 = vector.load %arg7[%c0_19, %c0_20] : memref<8x128xf32, #tpu.memory_space<vmem>>, vector<1x128xf32>
    %cst_21 = arith.constant dense<0.000000e+00> : vector<128xf32>
    %32 = vector.multi_reduction <add>, %19, %cst_21 [0] : vector<2x128xf32> to vector<128xf32>
    %33 = vector.shape_cast %32 : vector<128xf32> to vector<1x128xf32>
    %34 = arith.addf %31, %33 : vector<1x128xf32>
    %c0_22 = arith.constant 0 : index
    %c0_23 = arith.constant 0 : index
    %35 = vector.load %arg7[%c0_22, %c0_23] : memref<8x128xf32, #tpu.memory_space<vmem>>, vector<1x128xf32>
    tpu.vector_store %arg7[%c0_22, %c0_23], %34 {strides = array<i32>} : memref<8x128xf32, #tpu.memory_space<vmem>>, vector<1x128xf32>,
    %c0_i32_24 = arith.constant 0 : i32
    %36 = arith.cmpi eq, %arg1, %c0_i32_24 : i32
    %37 = arith.extui %36 : i1 to i32
    %c0_i32_25 = arith.constant 0 : i32
    %38 = arith.cmpi ne, %37, %c0_i32_25 : i32
    scf.if %38 {
      %c0_26 = arith.constant 0 : index
      %c0_27 = arith.constant 0 : index
      %39 = vector.load %arg5[%c0_26, %c0_27] : memref<8x128xf32, #tpu.memory_space<vmem>>, vector<8x128xf32>
      %cst_28 = arith.constant dense<0.000000e+00> : vector<8xf32>
      %40 = vector.multi_reduction <add>, %39, %cst_28 [1] : vector<8x128xf32> to vector<8xf32>
      %41 = vector.shape_cast %40 : vector<8xf32> to vector<8x1xf32>
      %cst_29 = arith.constant dense<0.000000e+00> : vector<1xf32>
      %42 = vector.multi_reduction <add>, %41, %cst_29 [0] : vector<8x1xf32> to vector<1xf32>
      %43 = vector.shape_cast %42 : vector<1xf32> to vector<1x1xf32>
      %c0_30 = arith.constant 0 : index
      %c0_31 = arith.constant 0 : index
      %44 = vector.load %arg6[%c0_30, %c0_31] : memref<8x128xf32, #tpu.memory_space<vmem>>, vector<8x128xf32>
      %cst_32 = arith.constant dense<0.000000e+00> : vector<8xf32>
      %45 = vector.multi_reduction <add>, %44, %cst_32 [1] : vector<8x128xf32> to vector<8xf32>
      %46 = vector.shape_cast %45 : vector<8xf32> to vector<8x1xf32>
      %cst_33 = arith.constant dense<0.000000e+00> : vector<1xf32>
      %47 = vector.multi_reduction <add>, %46, %cst_33 [0] : vector<8x1xf32> to vector<1xf32>
      %48 = vector.shape_cast %47 : vector<1xf32> to vector<1x1xf32>
      %c0_34 = arith.constant 0 : index
      %c0_35 = arith.constant 0 : index
      %49 = vector.load %arg7[%c0_34, %c0_35] : memref<8x128xf32, #tpu.memory_space<vmem>>, vector<8x128xf32>
      %cst_36 = arith.constant dense<0.000000e+00> : vector<8xf32>
      %50 = vector.multi_reduction <add>, %49, %cst_36 [1] : vector<8x128xf32> to vector<8xf32>
      %51 = vector.shape_cast %50 : vector<8xf32> to vector<8x1xf32>
      %cst_37 = arith.constant dense<0.000000e+00> : vector<1xf32>
      %52 = vector.multi_reduction <add>, %51, %cst_37 [0] : vector<8x1xf32> to vector<1xf32>
      %53 = vector.shape_cast %52 : vector<1xf32> to vector<1x1xf32>
      %cst_38 = arith.constant 1.000000e+00 : f32
      %54 = vector.broadcast %cst_38 : f32 to vector<1x1xf32>
      %55 = arith.maximumf %53, %54 : vector<1x1xf32>
      %56 = arith.divf %48, %55 : vector<1x1xf32>
      %57 = arith.mulf %43, %43 : vector<1x1xf32>
      %58 = arith.mulf %55, %55 : vector<1x1xf32>
      %59 = arith.divf %57, %58 : vector<1x1xf32>
      %cst_39 = arith.constant 8.500000e-01 : f32
      %60 = vector.broadcast %cst_39 : f32 to vector<1x1xf32>
      %61 = arith.mulf %60, %59 : vector<1x1xf32>
      %62 = arith.subf %56, %61 : vector<1x1xf32>
      %cst_40 = arith.constant 0.000000e+00 : f32
      %63 = vector.broadcast %cst_40 : f32 to vector<1x1xf32>
      %64 = arith.maximumf %62, %63 : vector<1x1xf32>
      %65 = math.sqrt %64 : vector<1x1xf32>
      %c0_41 = arith.constant 0 : index
      %c0_42 = arith.constant 0 : index
      %c0_43 = arith.constant 0 : index
      %66 = vector.load %arg4[%c0_41, %c0_42, %c0_43] : memref<1x1x1xf32, #tpu.memory_space<vmem>>, vector<1x1x1xf32>
      %67 = vector.shape_cast %66 : vector<1x1x1xf32> to vector<1x1xf32>
      %68 = vector.shape_cast %65 : vector<1x1xf32> to vector<1x1x1xf32>
      tpu.vector_store %arg4[%c0_41, %c0_42, %c0_43], %68 {strides = array<i32>} : memref<1x1x1xf32, #tpu.memory_space<vmem>>, vector<1x1x1xf32>,
    } else {
    }
    return
  }
  func.func @transform_0(%arg0: i32, %arg1: i32) -> (i32, i32, i32) {
    %c0_i32 = arith.constant 0 : i32
    %c0_i32_0 = arith.constant 0 : i32
    return %arg0, %arg1, %c0_i32 : i32, i32, i32
  }
  func.func @transform_1(%arg0: i32, %arg1: i32) -> (i32, i32, i32) {
    %c0_i32 = arith.constant 0 : i32
    %c0_i32_0 = arith.constant 0 : i32
    return %arg0, %arg1, %c0_i32 : i32, i32, i32
  }
  func.func @transform_2(%arg0: i32, %arg1: i32) -> (i32, i32, i32) {
    %c0_i32 = arith.constant 0 : i32
    %c0_i32_0 = arith.constant 0 : i32
    %c0_i32_1 = arith.constant 0 : i32
    return %arg0, %c0_i32, %c0_i32_0 : i32, i32, i32
  }
}

</mosaic_0001>

<bundles_post_ra>
// kernel: depth_sig_loss_pallas.1
= control target key start
LH: loop header
LB: loop body
LE: loop exit
PB: predicated region body
PF: predicated region fallthrough
CT: control target
= control target key end

     0   :  { %s447_s9 = smov 0   ;;  %s449_s10 = smov 0   ;;  %s492_s0 = inlined_call_operand.vmem [shape: f32[2,2,128], index: 0, kind: input, shape index: {}]   ;;  %s493_s1 = inlined_call_operand.vmem [shape: f32[2,2,128], index: 1, kind: input, shape index: {}]   ;;  %s494_s2 = inlined_call_operand.vmem [shape: f32[2,1,1], index: 2, kind: output, shape index: {}]  }
   0x1   :  { %s451_s11 = smov 0  }
   0x2 LB: > { %s24_s12 = sadd.s32 1, %s425_s10  ;;  %p366_p0 = scmp.ge.s32.totalorder %s429_s11, 1  ;;  %s429_s11 = sphi %s451_s11, %s12_s11   ;;  %s425_s10 = sphi %s449_s10, %s496_s10   ;;  %s421_s9 = sphi %s447_s9, %s495_s9  }
   0x3   : > { %p26_p1 = scmp.ge.s32.totalorder %s24_s12, 2  ;;  %p142_p2 = scmp.lt.s32.totalorder %s429_s11, 3 }
   0x5   : > { %s498_s12 = smov (%p26_p1, %s24_s12), 0  ;;  %p143_p3 = pnand %p366_p0, %p142_p2 }
   0x6   : > { %p171_p4 = scmp.lt.s32.totalorder (!%p143_p3), %s421_s9, 1  ;;  %v431_v0 = vmov (!%p143_p3), 0.0   ;;  %vm209_vm0 = vcmask (!%p143_p3), 1041408   ;;  %vm287_vm2 = vcmask (!%p143_p3), 0  }
   0x7   : > { %146 = sbr.rel (%p143_p3) target bundleno = 240 (0xf0), region = 28  ;;  %194 = vst [vmem:[#allocation4] sm:$0xff] (!%p143_p3), %v431_v0  ;;  %192 = vst [vmem:[#allocation2] sm:$0xff] (!%p143_p3), %v431_v0 }
   0x8   : > { %193 = vst [vmem:[#allocation3] sm:$0xff] (!%p143_p3), %v431_v0 }
   0xe   : > { %s500_s9 = smov (!%p171_p4, %s421_s9), 1  ;;  %v230_v13 = vld [vmem:[#allocation4] sm:$0x1]  ;;  %v208_v34 = vld [vmem:[#allocation2] sm:$0x1] }
   0xf   : > { %s367_s13 = sshll.u32 %s500_s9, 1  ;;  %v219_v37 = vld [vmem:[#allocation3] sm:$0x1]  ;;  %s187_s22 = scalar_lea.vmem %s494_s2, %s500_s9 }
  0x10   : > { %s184_s16 = scalar_lea.vmem %s493_s1, %s367_s13  ;;  %s177_s19 = scalar_lea.vmem %s492_s0, %s367_s13 }
  0x11   : > { %v196_v1 = vld [vmem:[%s184_s16] sm:$0x3] }
  0x12   : > { %v195_v2 = vld [vmem:[%s177_s19] sm:$0x3]  ;;  %vm197_vm1 = vcmp.gt.f32.partialorder %v196_v1, 0.0  ;;  %v201_v3 = vmax.f32 %v196_v1, 1e-05 }
  0x13   : > { %v198_v4 = vmax.f32 %v195_v2, 1e-05  ;;  %v369_v5 = vsel %vm197_vm1, 1.0, %v431_v0 }
  0x14   : > { %397 = vlog2.f32 %v201_v3  ;;  %v231_v6 = vsel %vm209_vm0, %v369_v5, 0.0 }
  0x15   : > { %v232_v7 = vrot.slane %v231_v6, 4  ;;  %399 = vlog2.f32 %v198_v4 }
  0x17   : > { %v233_v8 = vadd.f32 %v232_v7, %v231_v6 }
  0x19   : > { %v234_v9 = vrot.slane %v233_v8, 2 }
  0x1b   : > { %v235_v10 = vadd.f32 %v234_v9, %v233_v8 }
  0x1d   : > { %v236_v11 = vrot.slane %v235_v10, 1 }
  0x1e   : > { %v398_v12 = vpop.eup %397 }
  0x1f   : > { %v400_v14 = vpop.eup %399  ;;  %v203_v15 = vmul.f32 0.6931472, %v398_v12  ;;  %v237_v16 = vadd.f32 %v236_v11, %v235_v10 }
  0x20   : > { %v200_v17 = vmul.f32 0.6931472, %v400_v14 }
  0x21   : > { %v238_v18 = vadd.f32 %v237_v16, %v230_v13 }
  0x22   : > { %v204_v19 = vsub.f32 %v200_v17, %v203_v15 }
  0x23   : > { %239 = vst [vmem:[#allocation4] sm:$0x1] %v238_v18 }
  0x24   : > { %v205_v20 = vsel %vm197_vm1, %v204_v19, 0.0 }
  0x25   : > { %v220_v21 = vmul.f32 %v205_v20, %v205_v20  ;;  %v210_v22 = vsel %vm209_vm0, %v205_v20, 0.0 }
  0x26   : > { %v211_v23 = vrot.slane %v210_v22, 4 }
  0x27   : > { %v221_v24 = vsel %vm209_vm0, %v220_v21, 0.0 }
  0x28   : > { %v212_v25 = vadd.f32 %v211_v23, %v210_v22  ;;  %v222_v26 = vrot.slane %v221_v24, 4 }
  0x2a   : > { %v261_v27 = vld [vmem:[#allocation4] sm:$0xff]  ;;  %v213_v28 = vrot.slane %v212_v25, 2  ;;  %v223_v29 = vadd.f32 %v222_v26, %v221_v24 }
  0x2b   : > { %262 = vadd.xlane.f32.xlu0 %v261_v27 }
  0x2c   : > { %v214_v30 = vadd.f32 %v213_v28, %v212_v25  ;;  %v224_v31 = vrot.slane %v223_v29, 2 }
  0x2e   : > { %v215_v32 = vrot.slane %v214_v30, 1  ;;  %v225_v33 = vadd.f32 %v224_v31, %v223_v29 }
  0x30   : > { %v216_v35 = vadd.f32 %v215_v32, %v214_v30  ;;  %v226_v36 = vrot.slane %v225_v33, 1 }
  0x32   : > { %v217_v38 = vadd.f32 %v216_v35, %v208_v34  ;;  %v227_v39 = vadd.f32 %v226_v36, %v225_v33 }
  0x34   : > { %218 = vst [vmem:[#allocation2] sm:$0x1] %v217_v38  ;;  %v228_v40 = vadd.f32 %v227_v39, %v219_v37 }
  0x36   : > { %229 = vst [vmem:[#allocation3] sm:$0x1] %v228_v40 }
  0x3b   : > { %v243_v41 = vld [vmem:[#allocation2] sm:$0xff] }
  0x3c   : > { %244 = vadd.xlane.f32.xlu0 %v243_v41 }
  0x3d   : > { %v252_v42 = vld [vmem:[#allocation3] sm:$0xff] }
  0x3e   : > { %253 = vadd.xlane.f32.xlu1 %v252_v42 }
  0xb8   : > { %v263_v43 = vpop.xlane.xlu0 %262 }
  0xb9   : > { %v264_v44 = vrot.slane %v263_v43, 4 }
  0xbb   : > { %v265_v45 = vadd.f32 %v264_v44, %v263_v43 }
  0xbd   : > { %v266_v46 = vrot.slane %v265_v45, 2 }
  0xbf   : > { %v267_v47 = vadd.f32 %v266_v46, %v265_v45 }
  0xc1   : > { %v268_v48 = vrot.slane %v267_v47, 1 }
  0xc3   : > { %v269_v49 = vadd.f32 %v268_v48, %v267_v47 }
  0xc5   : > { %v270_v50 = vmax.f32 %v269_v49, 1.0 }
  0xc7   : > { %v274_v51 = vmul.f32 %v270_v50, %v270_v50 }
  0xc9   : > { %v245_v52 = vpop.xlane.xlu0 %244  ;;  %401 = vrcp.f32 %v274_v51 }
  0xca   : > { %v246_v53 = vrot.slane %v245_v52, 4  ;;  %403 = vrcp.f32 %v270_v50 }
  0xcb   : > { %v254_v54 = vpop.xlane.xlu1 %253 }
  0xcc   : > { %v247_v55 = vadd.f32 %v246_v53, %v245_v52  ;;  %v255_v56 = vrot.slane %v254_v54, 4 }
  0xce   : > { %v248_v57 = vrot.slane %v247_v55, 2  ;;  %v256_v58 = vadd.f32 %v255_v56, %v254_v54 }
  0xd0   : > { %v249_v59 = vadd.f32 %v248_v57, %v247_v55  ;;  %v257_v60 = vrot.slane %v256_v58, 2 }
  0xd2   : > { %v250_v61 = vrot.slane %v249_v59, 1  ;;  %v258_v62 = vadd.f32 %v257_v60, %v256_v58 }
  0xd3   : > { %v402_v3 = vpop.eup %401 }
  0xd4   : > { %v251_v63 = vadd.f32 %v250_v61, %v249_v59  ;;  %v259_v0 = vrot.slane %v258_v62, 1  ;;  %v404_v5 = vpop.eup %403 }
  0xd6   : > { %v273_v1 = vmul.f32 %v251_v63, %v251_v63  ;;  %v260_v2 = vadd.f32 %v259_v0, %v258_v62 }
  0xd8   : > { %v276_v4 = vmul.f32 %v402_v3, %v273_v1  ;;  %v272_v7 = vmul.f32 %v404_v5, %v260_v2 }
  0xda   : > { %v277_v6 = vmul.f32 0.85, %v276_v4 }
  0xdc   : > { %v278_v8 = vsub.f32 %v272_v7, %v277_v6 }
  0xde   : > { %v279_v9 = vmax.f32 %v278_v8, 0.0 }
  0xe0   : > { %405 = vrsqrt.f32 %v279_v9  ;;  %vm282_vm3 = vcmp.eq.f32.partialorder %v279_v9, inf  ;;  %v285_v12 = vand.u32 2147483648, %v279_v9  ;;  %vm284_vm4 = vcmp.eq.f32.partialorder %v279_v9, 0.0 }
  0xea   : > { %v406_v10 = vpop.eup %405 }
  0xeb   : > { %v281_v11 = vmul.f32 %v406_v10, %v279_v9 }
  0xed   : > { %v283_v13 = vsel %vm282_vm3, %v279_v9, %v281_v11 }
  0xee   : > { %v286_v14 = vsel %vm284_vm4, %v285_v12, %v283_v13 }
  0xef   : > { %288 = vst.msk [vmem:[%s187_s22] sm:$0x1] %vm287_vm2, %v286_v14 }
  0xf0 PF: > { %s12_s11 = sadd.s32 1, %s429_s11   ;;  %s495_s9 = smov %s425_s10 }
  0xf1   : > { %p9_p5 = scmp.ge.s32.totalorder %s12_s11, 4   ;;  %s496_s10 = smov %s498_s12 }
  0xf3   :  { %11 = sbr.rel (!%p9_p5) target bundleno = 2 (0x2), region = 69 }

</bundles_post_ra>
